<compile_context>
chip_gen: v5e
topology: v5e:2x2
jax: 0.10.0
libtpu: 0.0.40
codegen_flags: <defaults>
</compile_context>

<pallas_src>
import functools

import numpy as np
import jax
import jax.numpy as jnp
from jax.experimental import pallas as pl
from jax.experimental.pallas import tpu as pltpu


# ------------------------- interpolation matrices -----------------------------

def _interp_matrix(n_in: int, n_out: int) -> np.ndarray:
    """(n_out, n_in) matrix for 1-D linear resize with align_corners=True
    (matches nn.Upsample(scale_factor=2, mode='bilinear', align_corners=True))."""
    A = np.zeros((n_out, n_in), dtype=np.float32)
    if n_out == 1 or n_in == 1:
        A[:, 0] = 1.0
        return A
    scale = (n_in - 1) / (n_out - 1)
    for i in range(n_out):
        src = i * scale
        lo = min(int(np.floor(src)), n_in - 1)
        hi = min(lo + 1, n_in - 1)
        frac = src - lo
        A[i, lo] += 1.0 - frac
        A[i, hi] += frac
    return A


# ----------------------- roll-convention hardware probe ------------------------

_ROLL_MATCHES_NP = None


def _roll_matches_np() -> bool:
    """One-time probe of pltpu.roll's shift convention on the actual backend.

    True  -> pltpu.roll(x, s, axis) == np.roll(x, s, axis)  (out[i] = x[i - s]).
    The conv taps below only need out[i] = x[i + d], so the kernel is correct
    under either convention once the sign is known."""
    global _ROLL_MATCHES_NP
    if _ROLL_MATCHES_NP is None:
        def k(x_ref, o_ref):
            o_ref[...] = pltpu.roll(x_ref[...], 1, axis=1)

        with jax.ensure_compile_time_eval():
            x = jnp.tile(jnp.arange(128, dtype=jnp.float32)[None, :], (8, 1))
            y = pl.pallas_call(
                k, out_shape=jax.ShapeDtypeStruct((8, 128), jnp.float32))(x)
            # np.roll convention -> y[0, 0] == 127 ; flipped convention -> 1.
            _ROLL_MATCHES_NP = bool(y[0, 0] > 64.0)
    return _ROLL_MATCHES_NP


# ------------------------------ kernel helpers ---------------------------------

def _make_masks(H, W):
    """Border-validity masks (1, H*W) for each 3x3 tap offset (dy, dx)."""
    n = H * W
    idx = jax.lax.broadcasted_iota(jnp.int32, (1, n), 1)
    col = idx % W
    top = idx >= W               # output row >= 1      (needed when dy == -1)
    bot = idx < (H - 1) * W      # output row <= H - 2  (needed when dy == +1)
    left = col >= 1              # output col >= 1      (needed when dx == -1)
    right = col < (W - 1)        # output col <= W - 2  (needed when dx == +1)
    return {
        (-1, -1): top & left, (-1, 0): top, (-1, 1): top & right,
        (0, -1): left,        (0, 0): None, (0, 1): right,
        (1, -1): bot & left,  (1, 0): bot,  (1, 1): bot & right,
    }


def _conv3x3_acc(parts, H, W, masks, roll_sign):
    """3x3 SAME conv as 9 accumulated tap matmuls on lane-dense (C, H*W) activations.

    Each tap (ky, kx): (Cout, C) @ (C, H*W) on the MXU (f32 accumulation), then an XLU
    lane-roll by dy*W+dx plus a border mask (VPU select) to realize the spatial shift
    and the zero padding.  `parts` is a sequence of (weight_ref(9, Cout, C), x(C, H*W))
    so conv1 can consume the [x2 | upsampled-x1] channel concat without materializing it.
    """
    n = H * W
    acc = None
    for ky in range(3):
        for kx in range(3):
            dy, dx = ky - 1, kx - 1
            tap = ky * 3 + kx
            y = None
            for w_ref, xf in parts:
                p = jnp.dot(w_ref[tap], xf, preferred_element_type=jnp.float32)
                y = p if y is None else y + p
            d = dy * W + dx
            if d != 0:
                # want out[i] = y[i + d]  (wrapped values are killed by the mask below)
                y = pltpu.roll(y, (-roll_sign * d) % n, axis=1)
            m = masks[(dy, dx)]
            if m is not None:
                y = jnp.where(m, y, 0.0)
            acc = y if acc is None else acc + y
    return acc


# ------------------------------ fused kernel ----------------------------------

def _up_doubleconv_kernel(x1h_ref, x2_ref, awt_ref,
                          w1a_ref, w1b_ref, b1_ref,
                          w2_ref, b2_ref, o_ref, *, roll_sign):
    # Per grid step (one batch element):
    #   x1h_ref : (1, C1, H, w)   x1 already height-upsampled (+ height pad) by wrapper
    #   x2_ref  : (1, C2, H*W)    skip connection, lane-dense
    #   awt_ref : (w, W)          width interp matrix (width pad folded in as zero cols)
    #   w1a_ref : (9, mid, C2)    conv1 tap weights acting on x2 channels (BN1 folded)
    #   w1b_ref : (9, mid, C1)    conv1 tap weights acting on upsampled-x1 channels
    #   b1_ref  : (mid, 1)        folded BN1 bias
    #   w2_ref  : (9, mid, mid)   conv2 tap weights (BN2 scale folded)
    #   b2_ref  : (mid, 1)        folded BN2 bias
    #   o_ref   : (1, mid, H*W)   lane-dense output
    _, C1, H, w = x1h_ref.shape
    W = awt_ref.shape[1]
    n = H * W
    cdt = x2_ref.dtype

    masks = _make_masks(H, W)

    # ---- finish the bilinear 2x upsample: width pass as ONE fat MXU matmul --------
    v = x1h_ref[0].reshape(C1 * H, w)                                    # cheap merge
    u = jnp.dot(v, awt_ref[...], preferred_element_type=jnp.float32)    # (C1*H, W)
    x1u = u.reshape(C1, n).astype(cdt)          # channel-major, lane-dense (C1, H*W)

    x2f = x2_ref[0]                                                      # (C2, H*W)

    # ---- conv1 (3x3 SAME, no bias) + folded BN1 + ReLU: 9 accumulated tap matmuls.
    # The channel concat [x2, x1u] is never materialized: each tap's weight is split
    # into its x2 part and its x1 part and both partial matmuls accumulate in f32.
    acc1 = _conv3x3_acc(((w1a_ref, x2f), (w1b_ref, x1u)), H, W, masks, roll_sign)
    y1 = jnp.maximum(acc1 + b1_ref[...], 0.0)                            # (mid, H*W)

    # ---- conv2 (3x3 SAME, no bias) + folded BN2 + ReLU ----------------------------
    acc2 = _conv3x3_acc(((w2_ref, y1.astype(cdt)),), H, W, masks, roll_sign)
    y2 = jnp.maximum(acc2 + b2_ref[...], 0.0)

    o_ref[0] = y2.astype(o_ref.dtype)                 # unmasked, lane-dense store


# ------------------------------ Up.forward ------------------------------------

def _fold_bn(gamma, beta, mean, var, eps=1e-5):
    scale = gamma / jnp.sqrt(var + eps)
    bias = beta - mean * scale
    return scale, bias


def _vmem_limit_bytes() -> int:
    """Per-generation VMEM scoped limit (~75% of capacity, capped at 100 MiB)."""
    try:
        cap = int(pltpu.get_tpu_info().vmem_capacity_bytes)
    except Exception:
        cap = 0
    if cap <= 0:
        cap = 64 * 1024 * 1024
    return int(min(cap * 3 // 4, 100 * 1024 * 1024))


def up_forward(x1, x2, params):
    """Up(in_channels, out_channels, bilinear=True): bilinear 2x upsample of x1
    (align_corners=True), F.pad to x2's spatial size, concat [x2, x1] on channels,
    then DoubleConv (conv3x3 no-bias -> BN -> ReLU, twice, both to out_channels//2).
    BatchNorm is applied in eval mode (running stats folded into scale/bias)."""
    N, C1, h, w = x1.shape
    N2, C2, H, W = x2.shape
    assert N == N2
    Cin = C1 + C2
    H1, W1 = 2 * h, 2 * w
    diffY, diffX = H - H1, W - W1
    assert diffY >= 0 and diffX >= 0  # standard UNet: skip is never smaller

    cdt = x2.dtype  # MXU operand dtype follows the model dtype (bf16 stays bf16)

    # 1-D interp matrices with the F.pad centering offsets folded in as zero rows/cols.
    ah_np = np.zeros((H, h), np.float32)
    ah_np[diffY // 2: diffY // 2 + H1, :] = _interp_matrix(h, H1)
    awt_np = np.zeros((w, W), np.float32)
    awt_np[:, diffX // 2: diffX // 2 + W1] = _interp_matrix(w, W1).T
    ah = jnp.asarray(ah_np)
    awt = jnp.asarray(awt_np, dtype=cdt)

    w1, w2 = params["w1"], params["w2"]
    mid = w1.shape[0]
    s1 = params["scale1"].reshape(mid).astype(jnp.float32)
    s2 = params["scale2"].reshape(mid).astype(jnp.float32)
    b1 = params["bias1"].reshape(mid, 1).astype(jnp.float32)
    b2 = params["bias2"].reshape(mid, 1).astype(jnp.float32)

    # OIHW -> (tap=ky*3+kx, O, I) with the eval-mode BN scale folded into the weights,
    # so the kernel epilogue is just bias-add + ReLU.
    w1t = jnp.transpose(w1.astype(jnp.float32), (2, 3, 0, 1)).reshape(9, mid, Cin)
    w1t = w1t * s1[None, :, None]
    w1a = w1t[:, :, :C2].astype(cdt)   # acts on the skip connection x2 channels
    w1b = w1t[:, :, C2:].astype(cdt)   # acts on the upsampled x1 channels
    w2t = jnp.transpose(w2.astype(jnp.float32), (2, 3, 0, 1)).reshape(9, mid, mid)
    w2t = (w2t * s2[None, :, None]).astype(cdt)

    # Height pass of the separable bilinear upsample: one batched XLA matmul over the
    # small low-res x1.  This keeps the kernel free of cross-layout transposes — the
    # in-kernel width pass + flatten are then a single fat matmul plus plain reshapes.
    x1h = jnp.einsum('Hh,nchw->ncHw', ah, x1.astype(jnp.float32)).astype(cdt)

    # Lane-dense skip connection: contiguous, metadata-only reshape in HBM.
    x2f = x2.reshape(N, C2, H * W)

    roll_sign = 1 if _roll_matches_np() else -1
    kernel = functools.partial(_up_doubleconv_kernel, roll_sign=roll_sign)

    out = pl.pallas_call(
        kernel,
        out_shape=jax.ShapeDtypeStruct((N, mid, H * W), x2.dtype),
        grid=(N,),
        in_specs=[
            pl.BlockSpec((1, C1, H, w), lambda b: (b, 0, 0, 0)),
            pl.BlockSpec((1, C2, H * W), lambda b: (b, 0, 0)),
            pl.BlockSpec((w, W), lambda b: (0, 0)),
            pl.BlockSpec((9, mid, C2), lambda b: (0, 0, 0)),
            pl.BlockSpec((9, mid, C1), lambda b: (0, 0, 0)),
            pl.BlockSpec((mid, 1), lambda b: (0, 0)),
            pl.BlockSpec((9, mid, mid), lambda b: (0, 0, 0)),
            pl.BlockSpec((mid, 1), lambda b: (0, 0)),
        ],
        out_specs=pl.BlockSpec((1, mid, H * W), lambda b: (b, 0, 0)),
        compiler_params=pltpu.CompilerParams(
            dimension_semantics=("parallel",),
            vmem_limit_bytes=_vmem_limit_bytes()),
    )(x1h, x2f, awt, w1a, w1b, b1, w2t, b2)

    # (N, mid, H*W) -> (N, mid, H, W): contiguous, metadata-only reshape.
    return out.reshape(N, mid, H, W)


# --------------------------- pure-JAX reference --------------------------------

def _ref_forward(x1, x2, w1, s1, b1, w2, s2, b2):
    N, C1, h, w = x1.shape
    H1, W1 = 2 * h, 2 * w
    Ah = jnp.asarray(_interp_matrix(h, H1))
    Aw = jnp.asarray(_interp_matrix(w, W1))
    x1u = jnp.einsum('Hh,nchw->ncHw', Ah, x1)
    x1u = jnp.einsum('Ww,ncHw->ncHW', Aw, x1u)
    diffY = x2.shape[2] - H1
    diffX = x2.shape[3] - W1
    x1u = jnp.pad(x1u, ((0, 0), (0, 0),
                        (diffY // 2, diffY - diffY // 2),
                        (diffX // 2, diffX - diffX // 2)))
    x = jnp.concatenate([x2, x1u], axis=1)

    def conv_bn_relu(xx, wgt, s, b):
        y = jax.lax.conv_general_dilated(
            xx, wgt, window_strides=(1, 1), padding='SAME',
            dimension_numbers=('NCHW', 'OIHW', 'NCHW'))
        y = y * s[None, :, None, None] + b[None, :, None, None]
        return jnp.maximum(y, 0.0)

    x = conv_bn_relu(x, w1, s1, b1)
    x = conv_bn_relu(x, w2, s2, b2)
    return x


if __name__ == "__main__":
    key = jax.random.PRNGKey(0)
    N = 2
    C1, C2 = 4, 4                 # x1 (low-res) channels, x2 (skip) channels
    in_channels = C1 + C2         # Up(in_channels=8, out_channels=8, bilinear=True)
    out_channels = 8
    mid = out_channels // 2       # DoubleConv(8, 4): both convs output 4 channels
    h, w = 8, 8                   # x1 spatial; x2 is 2x that
    H, W = 2 * h, 2 * w

    keys = jax.random.split(key, 12)
    x1 = jax.random.normal(keys[0], (N, C1, h, w), jnp.float32)
    x2 = jax.random.normal(keys[1], (N, C2, H, W), jnp.float32)

    # Deterministic synthetic parameters (OIHW conv weights, bias-free convs).
    w1 = 0.1 * jax.random.normal(keys[2], (mid, in_channels, 3, 3), jnp.float32)
    g1 = 1.0 + 0.1 * jax.random.normal(keys[3], (mid,), jnp.float32)
    be1 = 0.1 * jax.random.normal(keys[4], (mid,), jnp.float32)
    m1 = 0.1 * jax.random.normal(keys[5], (mid,), jnp.float32)
    v1 = jnp.abs(jax.random.normal(keys[6], (mid,), jnp.float32)) + 0.5
    w2 = 0.1 * jax.random.normal(keys[7], (mid, mid, 3, 3), jnp.float32)
    g2 = 1.0 + 0.1 * jax.random.normal(keys[8], (mid,), jnp.float32)
    be2 = 0.1 * jax.random.normal(keys[9], (mid,), jnp.float32)
    m2 = 0.1 * jax.random.normal(keys[10], (mid,), jnp.float32)
    v2 = jnp.abs(jax.random.normal(keys[11], (mid,), jnp.float32)) + 0.5

    s1, bb1 = _fold_bn(g1, be1, m1, v1)
    s2, bb2 = _fold_bn(g2, be2, m2, v2)
    params = dict(w1=w1, scale1=s1, bias1=bb1, w2=w2, scale2=s2, bias2=bb2)

    _roll_matches_np()   # run the tiny hardware probe eagerly (cached for the jit trace)

    out = jax.jit(up_forward)(x1, x2, params)
    out = jax.block_until_ready(out)
    assert out.shape == (N, mid, H, W), out.shape
    assert bool(jnp.all(jnp.isfinite(out)))

    ref = _ref_forward(x1, x2, w1, s1, bb1, w2, s2, bb2)
    err = float(jnp.max(jnp.abs(out - ref)))
    assert err < 2e-3, f"max abs err {err}"
    print("KERNEL_OK")
</pallas_src>

<mosaic_0001>
module attributes {stable_mosaic.version = 11 : i64} {
  func.func @k(%arg0: memref<8x128xf32, #tpu.memory_space<vmem>>, %arg1: memref<8x128xf32, #tpu.memory_space<vmem>>) attributes {dimension_semantics = [], scalar_prefetch = 0 : i64, scratch_operands = 0 : i64, tpu.core_type = #tpu.core_type<tc>} {
    %c0 = arith.constant 0 : index
    %c0_0 = arith.constant 0 : index
    %0 = vector.load %arg0[%c0, %c0_0] : memref<8x128xf32, #tpu.memory_space<vmem>>, vector<8x128xf32>
    %c1_i32 = arith.constant 1 : i32
    %1 = tpu.dynamic_rotate %0 by %c1_i32 dim 1 : vector<8x128xf32>, i32 -> vector<8x128xf32>
    %c0_1 = arith.constant 0 : index
    %c0_2 = arith.constant 0 : index
    %2 = vector.load %arg1[%c0_1, %c0_2] : memref<8x128xf32, #tpu.memory_space<vmem>>, vector<8x128xf32>
    tpu.vector_store %arg1[%c0_1, %c0_2], %1 {strides = array<i32>} : memref<8x128xf32, #tpu.memory_space<vmem>>, vector<8x128xf32>,
    return
  }
}

</mosaic_0001>

<bundles_post_ra>
// kernel: tpu_custom_call.1
= control target key start
LH: loop header
LB: loop body
LE: loop exit
PB: predicated region body
PF: predicated region fallthrough
CT: control target
= control target key end

     0   :  { %6 = vsyncpa [#allocation3], 0  ;;  %s118_s0 = inlined_call_operand.hbm [shape: f32[8,128], index: 0, kind: input, shape index: {}]   ;;  %s119_s1 = inlined_call_operand.hbm [shape: f32[8,128], index: 1, kind: output, shape index: {}]  }
   0x1   :  { %7 = vsyncpa [#allocation4], 0  ;;  %s13_s8 = sshll.u32 %s118_s0, 4  ;;  %s99_s9 = smov [#allocation2]   ;;  %s14_s8 = int_to_ptr.hbm [resolvable:$true] %s13_s8 }
   0x2   :  { %s15_s10 = sshll.u32 %s99_s9, 4  ;;  %s16_s10 = int_to_ptr.vmem [resolvable:$true] %s15_s10 }
   0x3   :  { %18 = dma.hbm_to_vmem [thread:$0]  %s14_s8, 128, %s16_s10, [#allocation3]  }
   0x4   :  { %95 = dma.done.wait [#allocation3], 128  }
   0x5   :  { %96 = vsyncadd [#allocation3], 4294967168  ;;  %v23_v0 = vld [vmem:[#allocation2] sm:$0xff]  ;;  %s100_s11 = smov 1   ;;  %s101_s12 = smov [#allocation5]  }
   0x6   :  { %24 = vrot.lane.b32.xlu0 %v23_v0, %s100_s11  ;;  %s32_s13 = sshll.u32 %s101_s12, 4  ;;  %s34_s16 = sshll.u32 %s119_s1, 4  ;;  %s33_s13 = int_to_ptr.vmem [resolvable:$true] %s32_s13  ;;  %s35_s16 = int_to_ptr.hbm [resolvable:$true] %s34_s16 }
  0x78   :  { %v25_v1 = vpop.permute.xlu0 %24 }
  0x79   :  { %26 = vst [vmem:[#allocation5] sm:$0xff] %v25_v1 }
  0x7a   :  { %37 = dma.vmem_to_hbm [thread:$0]  %s33_s13, 128, %s35_s16, [#allocation4]  }
  0x7b   :  { %97 = dma.done.wait [#allocation4], 128  }
  0x7c   :  { %98 = vsyncadd [#allocation4], 4294967168 }
  0x7d   :  { %42 = vsyncpa [#allocation3], 1 }
  0x7e   :  { %43 = vsyncpa [#allocation4], 1 }

</bundles_post_ra>
